<compile_context>
chip_gen: v7x
topology: tpu7x:2x2x1
jax: 0.10.0
libtpu: 0.0.40
codegen_flags: <defaults>
</compile_context>

<pallas_src>
import functools
import math

import jax
import jax.numpy as jnp
from jax.experimental import pallas as pl
from jax.experimental.pallas import tpu as pltpu


# --------------------- generation-aware sizing ---------------------

def _vmem_capacity_bytes():
    try:
        return int(pltpu.get_tpu_info().vmem_capacity_bytes)
    except Exception:
        return 64 * 1024 * 1024  # conservative (v7x-sized) fallback


_VMEM_CAP = _vmem_capacity_bytes()
_VMEM_LIMIT = min((_VMEM_CAP * 3) // 4, 100 * 1024 * 1024)      # 48 MiB on v7x, ~96-100 MiB on v5e/v6e
_TM_PREF = 1024 if _VMEM_CAP >= 128 * 1024 * 1024 else 512      # bigger M tiles on 128 MiB parts
_W_RESIDENT_BYTES = 8 * 1024 * 1024                              # weights <= 8 MiB stay fully resident


def _round_up(x, m):
    return ((x + m - 1) // m) * m


def _tile(dim, pref, align):
    """Largest `align`-multiple divisor of `dim` that is <= pref; else the full dim."""
    if dim <= pref:
        return dim
    cand = (pref // align) * align
    while cand >= align:
        if dim % cand == 0:
            return cand
        cand -= align
    return dim


def _m_tile_and_pad(m):
    """16-aligned M tile near _TM_PREF; pad M to a tile multiple (review: pad, don't degrade)."""
    tm = min(_TM_PREF, _round_up(m, 16))
    return tm, _round_up(m, tm)


def _pad_rows(a, m_pad):
    m = a.shape[0]
    if m_pad == m:
        return a
    return jnp.pad(a, ((0, m_pad - m), (0, 0)))


# ----------------------------- Pallas kernels -----------------------------

def _linear_kernel(x_ref, w_ref, b_ref, o_ref, *, activation):
    """Single-pass matmul (full K resident weight); epilogue: +bias (+gelu)."""
    h = jnp.dot(x_ref[...], w_ref[...], preferred_element_type=jnp.float32) + b_ref[...]
    if activation == "gelu":
        # TODO(synk): HF BERT uses exact erf-gelu; tanh approx differs by ~1e-3 per activation.
        h = jax.nn.gelu(h, approximate=True)
    o_ref[...] = h.astype(o_ref.dtype)


def linear(x, w, b, activation=None, out_dtype=jnp.bfloat16):
    """x: [M, K] bf16, w: [K, N] bf16 (kept resident in VMEM), b: [N] f32 -> [M, N]."""
    m, k = x.shape
    n = w.shape[1]
    tm, m_pad = _m_tile_and_pad(m)
    tn = n if (k * n * w.dtype.itemsize) <= _W_RESIDENT_BYTES else _tile(n, 512, 128)
    xp = _pad_rows(x, m_pad)
    b2 = b.reshape(1, n).astype(jnp.float32)
    out = pl.pallas_call(
        functools.partial(_linear_kernel, activation=activation),
        out_shape=jax.ShapeDtypeStruct((m_pad, n), out_dtype),
        grid=(m_pad // tm, n // tn),
        in_specs=[
            pl.BlockSpec((tm, k), lambda i, j: (i, 0)),
            pl.BlockSpec((k, tn), lambda i, j: (0, j)),     # constant over i -> weight read once
            pl.BlockSpec((1, tn), lambda i, j: (0, j)),
        ],
        out_specs=pl.BlockSpec((tm, tn), lambda i, j: (i, j)),
        compiler_params=pltpu.CompilerParams(
            dimension_semantics=("parallel", "parallel"),
            vmem_limit_bytes=_VMEM_LIMIT),
    )(xp, w, b2)
    return out if m_pad == m else out[:m]


def _linear_res_ln_kernel(x_ref, w_ref, b_ref, res_ref, g_ref, be_ref, o_ref, *, eps):
    """Single-pass matmul (resident weight); epilogue fuses bias + residual + LayerNorm (f32 stats)."""
    h = jnp.dot(x_ref[...], w_ref[...], preferred_element_type=jnp.float32)
    h = h + b_ref[...] + res_ref[...].astype(jnp.float32)
    mean = jnp.mean(h, axis=-1, keepdims=True)
    var = jnp.mean(jnp.square(h - mean), axis=-1, keepdims=True)
    y = (h - mean) * jax.lax.rsqrt(var + eps) * g_ref[...] + be_ref[...]
    o_ref[...] = y.astype(o_ref.dtype)


def linear_res_ln(x, w, b, res, gamma, beta, eps=1e-12, out_dtype=jnp.bfloat16):
    """LayerNorm(x @ w + b + res).  N (= hidden) kept un-tiled so LN sees the full row."""
    m, k = x.shape
    n = w.shape[1]
    tm, m_pad = _m_tile_and_pad(m)
    xp = _pad_rows(x, m_pad)
    rp = _pad_rows(res, m_pad)
    b2 = b.reshape(1, n).astype(jnp.float32)
    g2 = gamma.reshape(1, n).astype(jnp.float32)
    be2 = beta.reshape(1, n).astype(jnp.float32)
    out = pl.pallas_call(
        functools.partial(_linear_res_ln_kernel, eps=eps),
        out_shape=jax.ShapeDtypeStruct((m_pad, n), out_dtype),
        grid=(m_pad // tm,),
        in_specs=[
            pl.BlockSpec((tm, k), lambda i: (i, 0)),
            pl.BlockSpec((k, n), lambda i: (0, 0)),          # resident weight
            pl.BlockSpec((1, n), lambda i: (0, 0)),
            pl.BlockSpec((tm, n), lambda i: (i, 0)),
            pl.BlockSpec((1, n), lambda i: (0, 0)),
            pl.BlockSpec((1, n), lambda i: (0, 0)),
        ],
        out_specs=pl.BlockSpec((tm, n), lambda i: (i, 0)),
        compiler_params=pltpu.CompilerParams(
            dimension_semantics=("parallel",),
            vmem_limit_bytes=_VMEM_LIMIT),
    )(xp, w, b2, rp, g2, be2)
    return out if m_pad == m else out[:m]


def _ln_kernel(x_ref, g_ref, b_ref, o_ref, *, eps):
    x = x_ref[...].astype(jnp.float32)
    mean = jnp.mean(x, axis=-1, keepdims=True)
    var = jnp.mean(jnp.square(x - mean), axis=-1, keepdims=True)
    y = (x - mean) * jax.lax.rsqrt(var + eps) * g_ref[...] + b_ref[...]
    o_ref[...] = y.astype(o_ref.dtype)


def layernorm(x, gamma, beta, eps=1e-12, out_dtype=jnp.bfloat16):
    """Plain LayerNorm over the last dim.  x: [N, H] (bf16 in -> half the HBM read)."""
    n, h = x.shape
    tm, n_pad = _m_tile_and_pad(n)
    xp = _pad_rows(x, n_pad)
    g2 = gamma.reshape(1, h).astype(jnp.float32)
    b2 = beta.reshape(1, h).astype(jnp.float32)
    out = pl.pallas_call(
        functools.partial(_ln_kernel, eps=eps),
        out_shape=jax.ShapeDtypeStruct((n_pad, h), out_dtype),
        grid=(n_pad // tm,),
        in_specs=[
            pl.BlockSpec((tm, h), lambda i: (i, 0)),
            pl.BlockSpec((1, h), lambda i: (0, 0)),
            pl.BlockSpec((1, h), lambda i: (0, 0)),
        ],
        out_specs=pl.BlockSpec((tm, h), lambda i: (i, 0)),
        compiler_params=pltpu.CompilerParams(
            dimension_semantics=("parallel",),
            vmem_limit_bytes=_VMEM_LIMIT),
    )(xp, g2, b2)
    return out if n_pad == n else out[:n]


def _attn_kernel(qkv_ref, mb_ref, o_ref, *, scale, num_heads, head_dim, tq):
    """qkv_ref: (1, S, 3, H) bf16 for one batch row (fetched once per row);
    o_ref: (1, tq, H) for the current query tile; per-head loop keeps the live
    f32 score slab at (tq, S) instead of (nH, S, S)."""
    if qkv_ref.shape[1] == tq:                       # single query tile -> static slice
        q_rows = qkv_ref[0, :, 0, :]                 # (tq, H)
    else:
        q0 = pl.multiple_of(pl.program_id(1) * tq, tq)
        q_rows = qkv_ref[0, pl.ds(q0, tq), 0, :]     # (tq, H)
    k_all = qkv_ref[0, :, 1, :]                      # (S, H)
    v_all = qkv_ref[0, :, 2, :]                      # (S, H)
    mb = mb_ref[0]                                   # (1, S) f32 additive mask bias

    ctxs = []
    for hd in range(num_heads):                      # static head loop (nH is small/static)
        sl = slice(hd * head_dim, (hd + 1) * head_dim)
        q = q_rows[:, sl]
        k = k_all[:, sl]
        v = v_all[:, sl]
        s = jax.lax.dot_general(q, k, (((1,), (1,)), ((), ())),
                                preferred_element_type=jnp.float32)
        s = s * scale + mb
        s = s - jnp.max(s, axis=-1, keepdims=True)
        p = jnp.exp(s)
        # reciprocal on the EUP (free slot) instead of a VALU divide.
        p = p * pl.reciprocal(jnp.sum(p, axis=-1, keepdims=True), approx=True)
        ctxs.append(jnp.dot(p.astype(v.dtype), v, preferred_element_type=jnp.float32))
    # One lane-dense store of all heads (output already in [B, S, H] layout -> no XLA transpose).
    o_ref[0] = jnp.concatenate(ctxs, axis=-1).astype(o_ref.dtype)


def attention(qkv, mask_bias, num_heads):
    """qkv: [B, S, 3, H] bf16 (contiguous reshape of the fused QKV matmul output);
    mask_bias: [B, 1, S] f32.  Returns [B, S, H] bf16 (no transposes needed)."""
    b, s, _, h = qkv.shape
    dh = h // num_heads
    scale = 1.0 / math.sqrt(dh)
    tq = _tile(s, 256, 8)
    nq = s // tq
    return pl.pallas_call(
        functools.partial(_attn_kernel, scale=scale, num_heads=num_heads,
                          head_dim=dh, tq=tq),
        out_shape=jax.ShapeDtypeStruct((b, s, h), qkv.dtype),
        grid=(b, nq),
        in_specs=[
            pl.BlockSpec((1, s, 3, h), lambda bi, qi: (bi, 0, 0, 0)),  # constant over qi -> K/V DMA'd once per row
            pl.BlockSpec((1, 1, s), lambda bi, qi: (bi, 0, 0)),
        ],
        out_specs=pl.BlockSpec((1, tq, h), lambda bi, qi: (bi, qi, 0)),
        compiler_params=pltpu.CompilerParams(
            dimension_semantics=("parallel", "arbitrary"),
            vmem_limit_bytes=_VMEM_LIMIT),
    )(qkv, mask_bias)


def _head_kernel(x_ref, g_ref, b_ref, w_ref, bias_ref, o_ref, *, eps):
    x = x_ref[...].astype(jnp.float32)
    mean = jnp.mean(x, axis=-1, keepdims=True)
    var = jnp.mean(jnp.square(x - mean), axis=-1, keepdims=True)
    h = (x - mean) * jax.lax.rsqrt(var + eps) * g_ref[...] + b_ref[...]
    # nn.Dropout(0.3) is the identity in eval mode.
    # TODO(synk): training-mode dropout would use pltpu.prng_seed + stateful_bernoulli.
    o_ref[...] = (jnp.dot(h.astype(w_ref.dtype), w_ref[...],
                          preferred_element_type=jnp.float32)
                  + bias_ref[...]).astype(o_ref.dtype)


def classifier_head(cls, gamma, beta, w_pad, b_pad, eps=1e-5):
    """Fused LayerNorm -> (Dropout eval) -> Linear into a 128-lane-padded slab.
    Batch dim padded to a sublane multiple (8) to avoid masked partial stores."""
    b, h = cls.shape
    npad = w_pad.shape[1]
    b_rows = _round_up(max(b, 8), 8)
    cls_p = _pad_rows(cls, b_rows)
    g2 = gamma.reshape(1, h).astype(jnp.float32)
    be2 = beta.reshape(1, h).astype(jnp.float32)
    bi2 = b_pad.reshape(1, npad).astype(jnp.float32)
    out = pl.pallas_call(
        functools.partial(_head_kernel, eps=eps),
        out_shape=jax.ShapeDtypeStruct((b_rows, npad), jnp.float32),
        grid=(1,),
        in_specs=[
            pl.BlockSpec((b_rows, h), lambda i: (0, 0)),
            pl.BlockSpec((1, h), lambda i: (0, 0)),
            pl.BlockSpec((1, h), lambda i: (0, 0)),
            pl.BlockSpec((h, npad), lambda i: (0, 0)),
            pl.BlockSpec((1, npad), lambda i: (0, 0)),
        ],
        out_specs=pl.BlockSpec((b_rows, npad), lambda i: (0, 0)),
        compiler_params=pltpu.CompilerParams(
            dimension_semantics=("arbitrary",),
            vmem_limit_bytes=_VMEM_LIMIT),
    )(cls_p, g2, be2, w_pad, bi2)
    return out[:b]


# ----------------------------- Model (glue) -----------------------------

def init_params(key, cfg):
    H, I, L = cfg["hidden"], cfg["intermediate"], cfg["layers"]
    V, P, T = cfg["vocab"], cfg["max_pos"], cfg["type_vocab"]
    nlabels = cfg["nlabels"]

    def nrm(k, shape):
        return 0.02 * jax.random.normal(k, shape, dtype=jnp.float32)

    keys = jax.random.split(key, 4 + 4 * L)
    it = iter(keys)
    params = {
        "word_emb": nrm(next(it), (V, H)),
        "pos_emb": nrm(next(it), (P, H)),
        "type_emb": nrm(next(it), (T, H)),
        "emb_ln_g": jnp.ones((H,), jnp.float32),
        "emb_ln_b": jnp.zeros((H,), jnp.float32),
        "layers": [],
    }
    for _ in range(L):
        params["layers"].append({
            # fused Q|K|V projection weight (bf16 for the MXU), biases stay f32
            "wqkv": nrm(next(it), (H, 3 * H)).astype(jnp.bfloat16),
            "bqkv": jnp.zeros((3 * H,), jnp.float32),
            "wo": nrm(next(it), (H, H)).astype(jnp.bfloat16),
            "bo": jnp.zeros((H,), jnp.float32),
            "ln1_g": jnp.ones((H,), jnp.float32), "ln1_b": jnp.zeros((H,), jnp.float32),
            "w1": nrm(next(it), (H, I)).astype(jnp.bfloat16),
            "b1": jnp.zeros((I,), jnp.float32),
            "w2": nrm(next(it), (I, H)).astype(jnp.bfloat16),
            "b2": jnp.zeros((H,), jnp.float32),
            "ln2_g": jnp.ones((H,), jnp.float32), "ln2_b": jnp.zeros((H,), jnp.float32),
        })
    params["cls_ln_g"] = jnp.ones((H,), jnp.float32)
    params["cls_ln_b"] = jnp.zeros((H,), jnp.float32)
    npad = max(128, _round_up(nlabels, 128))
    cls_w = nrm(next(it), (H, nlabels)).astype(jnp.bfloat16)
    params["cls_w_pad"] = jnp.zeros((H, npad), jnp.bfloat16).at[:, :nlabels].set(cls_w)
    params["cls_b_pad"] = jnp.zeros((npad,), jnp.float32)
    return params


def bert_encoder(params, input_ids, attention_mask, token_type_ids, cfg):
    B, S = input_ids.shape
    H, nH = cfg["hidden"], cfg["heads"]
    N = B * S

    # Embedding lookups are gather glue; LN runs in a Pallas kernel.
    emb = (jnp.take(params["word_emb"], input_ids, axis=0)
           + params["pos_emb"][:S][None, :, :]
           + jnp.take(params["type_emb"], token_type_ids, axis=0))          # [B,S,H] f32
    # bf16 cast before the mem-bound LN kernel halves its HBM read; stats stay f32 inside.
    x = layernorm(emb.astype(jnp.bfloat16).reshape(N, H),
                  params["emb_ln_g"], params["emb_ln_b"])                    # [N,H] bf16

    # Additive mask bias kept in f32 (scores are f32 inside the attention kernel).
    mask_bias = ((1.0 - attention_mask.astype(jnp.float32)) * (-1e9)).reshape(B, 1, S)

    for lyr in params["layers"]:
        # Fused QKV projection: one [N,H] x [H,3H] matmul (weight resident in VMEM).
        qkv = linear(x, lyr["wqkv"], lyr["bqkv"])                            # [N, 3H] bf16
        # Contiguous reshape only -- no XLA transpose -- attention reads per-head slices itself.
        ctx = attention(qkv.reshape(B, S, 3, H), mask_bias, nH)              # [B, S, H] bf16
        # Output projection with fused bias + residual + LayerNorm epilogue.
        x = linear_res_ln(ctx.reshape(N, H), lyr["wo"], lyr["bo"], x,
                          lyr["ln1_g"], lyr["ln1_b"], eps=1e-12)
        # FFN: gelu fused in the first matmul, residual+LN fused in the second.
        h = linear(x, lyr["w1"], lyr["b1"], activation="gelu")               # [N, I] bf16
        x = linear_res_ln(h, lyr["w2"], lyr["b2"], x,
                          lyr["ln2_g"], lyr["ln2_b"], eps=1e-12)

    return x.reshape(B, S, H)


def single_classifier_forward(params, batch, cfg):
    last_hidden = bert_encoder(params, batch["input_ids"], batch["attention_mask"],
                               batch["token_type_ids"], cfg)
    cls = last_hidden[:, 0]                                 # x.last_hidden_state[:, 0]
    logits_pad = classifier_head(cls, params["cls_ln_g"], params["cls_ln_b"],
                                 params["cls_w_pad"], params["cls_b_pad"], eps=1e-5)
    return logits_pad[:, :cfg["nlabels"]]                   # slice the lane-padded slab


# ----------------------------- Driver -----------------------------

if __name__ == "__main__":
    cfg = dict(vocab=64, hidden=32, heads=2, layers=2, intermediate=64,
               max_pos=16, type_vocab=2, nlabels=3)
    B, S = 2, 8

    key = jax.random.PRNGKey(0)
    kp, kid, kmask = jax.random.split(key, 3)
    params = init_params(kp, cfg)

    input_ids = jax.random.randint(kid, (B, S), 0, cfg["vocab"], dtype=jnp.int32)
    attention_mask = jnp.ones((B, S), dtype=jnp.int32).at[1, 6:].set(0)  # ragged mask
    token_type_ids = jnp.zeros((B, S), dtype=jnp.int32)
    batch = {"input_ids": input_ids, "attention_mask": attention_mask,
             "token_type_ids": token_type_ids}

    logits = single_classifier_forward(params, batch, cfg)
    jax.block_until_ready(logits)
    assert logits.shape == (B, cfg["nlabels"]) and bool(jnp.all(jnp.isfinite(logits)))
    print("KERNEL_OK")
</pallas_src>

<mosaic_0001>
module attributes {stable_mosaic.version = 11 : i64} {
  func.func @_ln_kernel(%arg0: i32, %arg1: memref<16x32xbf16, #tpu.memory_space<vmem>>, %arg2: memref<1x32xf32, #tpu.memory_space<vmem>>, %arg3: memref<1x32xf32, #tpu.memory_space<vmem>>, %arg4: memref<16x32xbf16, #tpu.memory_space<vmem>>) attributes {dimension_semantics = [#tpu.dimension_semantics<parallel>], iteration_bounds = array<i64: 1>, scalar_prefetch = 0 : i64, scratch_operands = 0 : i64, tpu.core_type = #tpu.core_type<tc>, window_params = [{transform_indices = @transform_0, window_bounds = array<i64: 16, 32>}, {pipeline_mode = #tpu.pipeline_mode<synchronous>, transform_indices = @transform_1, window_bounds = array<i64: 1, 32>}, {pipeline_mode = #tpu.pipeline_mode<synchronous>, transform_indices = @transform_2, window_bounds = array<i64: 1, 32>}, {transform_indices = @transform_3, window_bounds = array<i64: 16, 32>}]} {
    %c0 = arith.constant 0 : index
    %c0_0 = arith.constant 0 : index
    %0 = vector.load %arg1[%c0, %c0_0] : memref<16x32xbf16, #tpu.memory_space<vmem>>, vector<16x32xbf16>
    %1 = arith.extf %0 : vector<16x32xbf16> to vector<16x32xf32>
    %cst = arith.constant dense<0.000000e+00> : vector<16xf32>
    %2 = vector.multi_reduction <add>, %1, %cst [1] : vector<16x32xf32> to vector<16xf32>
    %3 = vector.shape_cast %2 : vector<16xf32> to vector<16x1xf32>
    %cst_1 = arith.constant 3.200000e+01 : f32
    %4 = vector.broadcast %cst_1 : f32 to vector<16x1xf32>
    %5 = arith.divf %3, %4 : vector<16x1xf32>
    %6 = vector.broadcast %5 : vector<16x1xf32> to vector<16x32xf32>
    %7 = arith.subf %1, %6 : vector<16x32xf32>
    %8 = arith.mulf %7, %7 : vector<16x32xf32>
    %cst_2 = arith.constant dense<0.000000e+00> : vector<16xf32>
    %9 = vector.multi_reduction <add>, %8, %cst_2 [1] : vector<16x32xf32> to vector<16xf32>
    %10 = vector.shape_cast %9 : vector<16xf32> to vector<16x1xf32>
    %cst_3 = arith.constant 3.200000e+01 : f32
    %11 = vector.broadcast %cst_3 : f32 to vector<16x1xf32>
    %12 = arith.divf %10, %11 : vector<16x1xf32>
    %13 = vector.broadcast %5 : vector<16x1xf32> to vector<16x32xf32>
    %14 = arith.subf %1, %13 : vector<16x32xf32>
    %cst_4 = arith.constant 9.99999996E-13 : f32
    %15 = vector.broadcast %cst_4 : f32 to vector<16x1xf32>
    %16 = arith.addf %12, %15 : vector<16x1xf32>
    %17 = math.rsqrt %16 : vector<16x1xf32>
    %18 = vector.broadcast %17 : vector<16x1xf32> to vector<16x32xf32>
    %19 = arith.mulf %14, %18 : vector<16x32xf32>
    %c0_5 = arith.constant 0 : index
    %c0_6 = arith.constant 0 : index
    %20 = vector.load %arg2[%c0_5, %c0_6] : memref<1x32xf32, #tpu.memory_space<vmem>>, vector<1x32xf32>
    %21 = vector.broadcast %20 : vector<1x32xf32> to vector<16x32xf32>
    %22 = arith.mulf %19, %21 : vector<16x32xf32>
    %c0_7 = arith.constant 0 : index
    %c0_8 = arith.constant 0 : index
    %23 = vector.load %arg3[%c0_7, %c0_8] : memref<1x32xf32, #tpu.memory_space<vmem>>, vector<1x32xf32>
    %24 = vector.broadcast %23 : vector<1x32xf32> to vector<16x32xf32>
    %25 = arith.addf %22, %24 : vector<16x32xf32>
    %26 = arith.truncf %25 : vector<16x32xf32> to vector<16x32xbf16>
    %c0_9 = arith.constant 0 : index
    %c0_10 = arith.constant 0 : index
    %27 = vector.load %arg4[%c0_9, %c0_10] : memref<16x32xbf16, #tpu.memory_space<vmem>>, vector<16x32xbf16>
    tpu.vector_store %arg4[%c0_9, %c0_10], %26 {strides = array<i32>} : memref<16x32xbf16, #tpu.memory_space<vmem>>, vector<16x32xbf16>,
    return
  }
  func.func @transform_0(%arg0: i32) -> (i32, i32) {
    %c0_i32 = arith.constant 0 : i32
    %c0_i32_0 = arith.constant 0 : i32
    return %arg0, %c0_i32 : i32, i32
  }
  func.func @transform_1(%arg0: i32) -> (i32, i32) {
    %c0_i32 = arith.constant 0 : i32
    %c0_i32_0 = arith.constant 0 : i32
    %c0_i32_1 = arith.constant 0 : i32
    return %c0_i32, %c0_i32_0 : i32, i32
  }
  func.func @transform_2(%arg0: i32) -> (i32, i32) {
    %c0_i32 = arith.constant 0 : i32
    %c0_i32_0 = arith.constant 0 : i32
    %c0_i32_1 = arith.constant 0 : i32
    return %c0_i32, %c0_i32_0 : i32, i32
  }
  func.func @transform_3(%arg0: i32) -> (i32, i32) {
    %c0_i32 = arith.constant 0 : i32
    %c0_i32_0 = arith.constant 0 : i32
    return %arg0, %c0_i32 : i32, i32
  }
}

</mosaic_0001>

<bundles_post_ra>
// kernel: tpu_custom_call.1
= control target key start
LH: loop header
LB: loop body
LE: loop exit
PB: predicated region body
PF: predicated region fallthrough
CT: control target
= control target key end

     0   :  { %8 = vsyncpa [#allocation3], 0  ;;  %s237_s0 = inlined_call_operand.hbm [shape: bf16[16,32], index: 0, kind: input, shape index: {}]   ;;  %s238_s1 = inlined_call_operand.vmem [shape: f32[1,32], index: 1, kind: input, shape index: {}]   ;;  %s239_s2 = inlined_call_operand.vmem [shape: f32[1,32], index: 2, kind: input, shape index: {}]   ;;  %s240_s3 = inlined_call_operand.hbm [shape: bf16[16,32], index: 3, kind: output, shape index: {}]  }
   0x1   :  { %9 = vsyncpa [#allocation4], 0  ;;  %s173_s12 = smov [#allocation2]   ;;  %s125_s16 = scalar_lea.hbm %s237_s0, 128 }
   0x2   :  { %s15_s13 = sshll.u32 %s173_s12, 4  ;;  %p126_p0 = scmp.ne.s32.totalorder %s237_s0, %s125_s16  ;;  %s16_s13 = int_to_ptr.vmem [resolvable:$true] %s15_s13 }
   0x3   :  { %p129_p1 = scmp.lt.u32.totalorder %s125_s16, %s237_s0 }
   0x5   :  { %p131_p2 = pnand %p129_p1, %p126_p0 }
   0x7   :  { %134 = shalt.err (!%p131_p2)
}
   0x8   :  { %s135_s21 = scalar_lea.vmem %s16_s13, 128  ;;  %p140_p4 = scmp.lt.s32.totalorder %s16_s13, %s16_s13 }
   0x9   :  { %p136_p3 = scmp.ne.s32.totalorder %s16_s13, %s135_s21  ;;  %p141_p5 = scmp.lt.s32.totalorder %s135_s21, %s135_s21 }
   0xb   :  { %p142_p6 = por %p141_p5, %p140_p4 }
   0xd   :  { %p143_p7 = pnand %p142_p6, %p136_p3 }
   0xf   :  { %146 = shalt.err (!%p143_p7)
}
  0x10   :  { %s174_s22 = smov 64   ;;  %s175_s23 = smov 4  }
  0x11   :  { %21 = dma.hbm_to_vmem [thread:$0]  %s237_s0, 128, %s16_s13, [#allocation3], %s174_s22, %s174_s22, %s175_s23  }
  0x12   :  { %169 = dma.done.wait [#allocation3], 128  }
  0x13   :  { %170 = vsyncadd [#allocation3], 4294967168  ;;  %v114_v0 = vld [vmem:[#allocation2] sm:$0xff]   ;;  %vm33_vm0 = vcmask 261120   ;;  %vm87_vm1 = vcmask 257024   ;;  %s176_s29 = smov [#allocation5]  }
  0x14   :  { %v115_v1 = vunpack.c.l.bf16 %v114_v0  ;;  %v116_v2 = vunpack.c.h.bf16 %v114_v0  ;;  %v107_v22 = vld [vmem:[%s238_s1] ss:$0 sm:$0xff]  ;;  %s95_s30 = sshll.u32 %s176_s29, 4  ;;  %s96_s30 = int_to_ptr.vmem [resolvable:$true] %s95_s30 }
  0x15   :  { %v108_v24 = vld [vmem:[%s239_s2] ss:$0 sm:$0xff]  ;;  %s147_s1 = scalar_lea.vmem %s96_s30, 128  ;;  %p152_p9 = scmp.lt.s32.totalorder %s96_s30, %s96_s30 }
  0x16   :  { %v34_v3 = vsel %vm33_vm0, %v115_v1, 0.0  ;;  %v37_v4 = vsel %vm33_vm0, %v116_v2, 0.0  ;;  %p148_p8 = scmp.ne.s32.totalorder %s96_s30, %s147_s1  ;;  %p153_p10 = scmp.lt.s32.totalorder %s147_s1, %s147_s1 }
  0x17   :  { %35 = vadd.xlane.f32.xlu0 %v34_v3 }
  0x18   :  { %p154_p11 = por %p153_p10, %p152_p9 }
  0x1a   :  { %p155_p12 = pnand %p154_p11, %p148_p8 }
  0x1b   :  { %38 = vadd.xlane.f32.xlu0 %v37_v4 }
  0xa4   :  { %v36_v5 = vpop.xlane.xlu0 %35 }
  0xa5   :  { %v41_v6 = vmul.f32 0.03125, %v36_v5 }
  0xa7   :  { %v43_v7 = vsub.f32 %v115_v1, %v41_v6 }
  0xa8   :  { %v39_v8 = vpop.xlane.xlu0 %38 }
  0xa9   :  { %v42_v9 = vmul.f32 0.03125, %v39_v8  ;;  %v45_v10 = vmul.f32 %v43_v7, %v43_v7 }
  0xab   :  { %v44_v11 = vsub.f32 %v116_v2, %v42_v9  ;;  %v47_v12 = vsel %vm33_vm0, %v45_v10, 0.0 }
  0xac   :  { %48 = vadd.xlane.f32.xlu1 %v47_v12 }
  0xad   :  { %v46_v13 = vmul.f32 %v44_v11, %v44_v11 }
  0xaf   :  { %v50_v14 = vsel %vm33_vm0, %v46_v13, 0.0 }
  0xb0   :  { %51 = vadd.xlane.f32.xlu1 %v50_v14 }
 0x139   :  { %v49_v15 = vpop.xlane.xlu1 %48 }
 0x13a   :  { %v53_v16 = vmul.f32 0.03125, %v49_v15 }
 0x13c   :  { %v55_v17 = vadd.f32 1e-12, %v53_v16 }
 0x13d   :  { %v52_v18 = vpop.xlane.xlu1 %51 }
 0x13e   :  { %121 = vrsqrt.f32 %v55_v17  ;;  %v54_v19 = vmul.f32 0.03125, %v52_v18 }
 0x140   :  { %v56_v20 = vadd.f32 1e-12, %v54_v19 }
 0x142   :  { %123 = vrsqrt.f32 %v56_v20 }
 0x148   :  { %v122_v21 = vpop.eup %121 }
 0x149   :  { %v59_v23 = vmul.f32 %v122_v21, %v43_v7 }
 0x14b   :  { %v68_v25 = vmul.f32 %v107_v22, %v59_v23 }
 0x14c   :  { %v124_v26 = vpop.eup %123 }
 0x14d   :  { %v60_v27 = vmul.f32 %v124_v26, %v44_v11  ;;  %v77_v28 = vadd.f32 %v108_v24, %v68_v25 }
 0x14f   :  { %v69_v29 = vmul.f32 %v107_v22, %v60_v27  ;;  %v111_v30 = vpack.c.bf16 %v77_v28, %v77_v28 }
 0x151   :  { %v78_v31 = vadd.f32 %v108_v24, %v69_v29  ;;  %88 = vst.msk [vmem:[#allocation5] sm:$0xf] %vm87_vm1, %v111_v30 }
 0x153   :  { %v112_v32 = vpack.c.bf16 %v78_v31, %v78_v31 }
 0x155   :  { %89 = vst.msk [vmem:[#allocation5 + $0x4] sm:$0xf] %vm87_vm1, %v112_v32 }
 0x156   :  { %158 = shalt.err (!%p155_p12)
}
 0x157   :  { %s159_s5 = scalar_lea.hbm %s240_s3, 128 }
 0x158   :  { %p160_p13 = scmp.ne.s32.totalorder %s240_s3, %s159_s5  ;;  %p163_p0 = scmp.lt.u32.totalorder %s159_s5, %s240_s3 }
 0x15a   :  { %p165_p1 = pnand %p163_p0, %p160_p13 }
 0x15c   :  { %168 = shalt.err (!%p165_p1)
}
 0x15d   :  { %101 = dma.vmem_to_hbm [thread:$0]  %s96_s30, 128, %s240_s3, [#allocation4], %s174_s22, %s174_s22, %s175_s23  }
 0x15e   :  { %171 = dma.done.wait [#allocation4], 128  }
 0x15f   :  { %172 = vsyncadd [#allocation4], 4294967168 }
 0x160   :  { %105 = vsyncpa [#allocation3], 1 }
 0x161   :  { %106 = vsyncpa [#allocation4], 1 }

</bundles_post_ra>
